<compile_context>
chip_gen: v7x
topology: tpu7x:2x2x1
jax: 0.10.0
libtpu: 0.0.40
codegen_flags: <defaults>
</compile_context>

<pallas_src>
import functools

import jax
import jax.numpy as jnp
from jax.experimental import pallas as pl
from jax.experimental.pallas import tpu as pltpu


def _round_up(x, m):
    return ((x + m - 1) // m) * m


def _pick_lane_tile(n, granule=128, max_tile=65536):
    """Lane-dense tile along `n`.

    Multiple of `granule`, capped at `max_tile`, and (when the data spans more
    than one granule) small enough that the 1-D grid has >= 2 steps so the
    v7x megacore can shard the "parallel" axis across both TensorCores.
    Returns (tile, padded_n) with padded_n a multiple of tile.
    """
    npad_g = _round_up(max(int(n), 1), granule)
    gr_per_tile = max(1, min(npad_g // (2 * granule), max_tile // granule))
    tile = granule * gr_per_tile
    return tile, _round_up(npad_g, tile)


# -----------------------------------------------------------------------------
# Kernel 1: per-voxel mean of point features (channels-first, V on lanes).
#   feats_cf: (T, C, Vp) float, cnts: (1, Vp) int  ->  (C, Vp) float
# -----------------------------------------------------------------------------
def _voxel_mean_kernel(feat_ref, cnt_ref, out_ref):
    feats = feat_ref[...]                                # (T, C, TV) lane-dense
    s = jnp.sum(feats, axis=0)                           # (C, TV): T-1 vector adds
    # Reciprocal on the (1, TV) lane vector, then sublane-broadcast multiply.
    # (Same div-by-zero hazard as the PyTorch reference for real zero counts.)
    inv = 1.0 / cnt_ref[...].astype(s.dtype)             # (1, TV)
    out_ref[...] = (s * inv).astype(out_ref.dtype)


def voxel_feature_mean(features, num_voxels):
    """features: (V, T, C); num_voxels: (V,) int.  Returns (V, C) mean."""
    V, T, C = features.shape
    c_pad = _round_up(C, 8)
    # Cap the feature block at ~2 MiB of VMEM (T * ceil(C/8)*8 * TV * 4 bytes)
    # so the double-buffered pipeline fits v5e's 16 MiB scoped-VMEM default.
    max_tile = max(128, min(65536, ((2 << 20) // (T * c_pad * 4)) // 128 * 128))
    TV, Vp = _pick_lane_tile(V, granule=128, max_tile=max_tile)

    feats_cf = jnp.transpose(features, (1, 2, 0))         # (T, C, V), tiny pass
    cnts = num_voxels.reshape(1, V)
    if Vp != V:
        # Fold padding into the existing copies (no separate jnp.pad pass).
        feats_cf = jnp.concatenate(
            [feats_cf, jnp.zeros((T, C, Vp - V), features.dtype)], axis=-1)
        cnts = jnp.concatenate(
            [cnts, jnp.ones((1, Vp - V), cnts.dtype)], axis=-1)

    out_cf = pl.pallas_call(
        _voxel_mean_kernel,
        out_shape=jax.ShapeDtypeStruct((C, Vp), features.dtype),
        grid_spec=pltpu.PrefetchScalarGridSpec(
            num_scalar_prefetch=0,
            grid=(Vp // TV,),
            in_specs=[
                pl.BlockSpec((T, C, TV), lambda i: (0, 0, i)),
                pl.BlockSpec((1, TV), lambda i: (0, i)),
            ],
            out_specs=pl.BlockSpec((C, TV), lambda i: (0, i)),
        ),
        compiler_params=pltpu.CompilerParams(
            dimension_semantics=("parallel",)),
    )(feats_cf, cnts)
    return jnp.transpose(out_cf[:, :V])                   # back to (V, C)


# -----------------------------------------------------------------------------
# Kernel 2: shift xyz by pc_range[0:3], channels-first (3, N) with N on lanes.
#   Offsets are baked-in scalars -> one scalar-broadcast subtract per row.
# -----------------------------------------------------------------------------
def _xyz_shift_kernel(pts_ref, out_ref, *, px, py, pz):
    out_ref[0:1, :] = pts_ref[0:1, :] - px
    out_ref[1:2, :] = pts_ref[1:2, :] - py
    out_ref[2:3, :] = pts_ref[2:3, :] - pz


def absl_to_relative_xyz(points_list, pc_range, *, max_lanes_per_tile=65536):
    """points_list: list of (N_i, Cp) float arrays, Cp >= 3.

    Returns shifted xyz, shape (sum N_i, 3).
    """
    dtype = points_list[0].dtype
    N = sum(int(p.shape[0]) for p in points_list)
    TN, Np = _pick_lane_tile(N, granule=128, max_tile=max_lanes_per_tile)

    # Build the channels-first (3, Np) slab in one fused XLA slice+transpose+
    # concat pass; only the xyz columns ever reach the kernel and the lane
    # padding rides along in the same concatenate (no extra jnp.pad pass).
    cols = [jnp.transpose(p[:, :3]) for p in points_list]
    if Np != N:
        cols.append(jnp.zeros((3, Np - N), dtype))
    pts_cf = cols[0] if len(cols) == 1 else jnp.concatenate(cols, axis=1)

    kernel = functools.partial(
        _xyz_shift_kernel,
        px=float(pc_range[0]), py=float(pc_range[1]), pz=float(pc_range[2]))

    # Per-block VMEM: 8 sublanes * TN lanes * 4 B <= 2 MiB at TN=65536;
    # in + out, double-buffered, stays well under v5e's 16 MiB default.
    xyz_cf = pl.pallas_call(
        kernel,
        out_shape=jax.ShapeDtypeStruct((3, Np), dtype),
        grid_spec=pltpu.PrefetchScalarGridSpec(
            num_scalar_prefetch=0,
            grid=(Np // TN,),
            in_specs=[pl.BlockSpec((3, TN), lambda i: (0, i))],
            out_specs=pl.BlockSpec((3, TN), lambda i: (0, i)),
        ),
        compiler_params=pltpu.CompilerParams(
            dimension_semantics=("parallel",)),
    )(pts_cf)
    return jnp.transpose(xyz_cf[:, :N])                   # downstream wants (N, 3)


# -----------------------------------------------------------------------------
# Module wrapper (forward-pass semantics of the PyTorch module).
# -----------------------------------------------------------------------------
class VoxelFeatureExtractor:
    def __init__(self, pc_range, num_input_features=4,
                 name='VoxelFeatureExtractor', **kwargs):
        self.name = name
        self.num_input_features = num_input_features
        self.pc_range = pc_range

    def forward(self, data, **kwargs):
        features = data['features']                        # (V, T, C)
        num_voxels = data['num_voxels']                     # (V,)
        # Same assert as the PyTorch reference, then the (no-op) slice.
        assert self.num_input_features == features.shape[-1]
        data['features'] = voxel_feature_mean(
            features[:, :, :self.num_input_features], num_voxels)

        points_list = data.pop('points')
        cnts = [int(p.shape[0]) for p in points_list]
        data['xyz'] = absl_to_relative_xyz(points_list, self.pc_range)
        # Pass-through columns never touch any kernel; zero-width when Cp == 3.
        all_pts = (points_list[0] if len(points_list) == 1
                   else jnp.concatenate(points_list, axis=0))
        data['pt_features'] = all_pts[:, 3:]
        data['xyz_batch_cnt'] = jnp.asarray(cnts, dtype=jnp.int32)
        return data


if __name__ == "__main__":
    key = jax.random.PRNGKey(0)
    k1, k2, k3, k4 = jax.random.split(key, 4)

    # Voxelized features: V voxels, up to T points each, C_in channels.
    V, T, C_in = 32, 5, 4
    pc_range = [-50.0, -50.0, -5.0, 50.0, 50.0, 3.0]
    features = jax.random.uniform(k1, (V, T, C_in), jnp.float32, -1.0, 1.0)
    num_voxels = jax.random.randint(k2, (V,), 1, T + 1).astype(jnp.int32)

    # Raw points: batch of 2 clouds, Cp=5 columns (x, y, z, intensity, ring).
    N1, N2, Cp = 96, 64, 5
    pts1 = jax.random.uniform(k3, (N1, Cp), jnp.float32, -40.0, 40.0)
    pts2 = jax.random.uniform(k4, (N2, Cp), jnp.float32, -40.0, 40.0)

    module = VoxelFeatureExtractor(pc_range=pc_range, num_input_features=C_in)
    data = module.forward({
        'features': features,
        'num_voxels': num_voxels,
        'points': [pts1, pts2],
    })

    mean = jax.block_until_ready(data['features'])
    xyz = jax.block_until_ready(data['xyz'])
    feats = jax.block_until_ready(data['pt_features'])
    cnts = jax.block_until_ready(data['xyz_batch_cnt'])

    # Pure-JAX reference checks.
    ref_mean = features.sum(axis=1) / num_voxels.astype(jnp.float32)[:, None]
    all_pts = jnp.concatenate([pts1, pts2], axis=0)
    ref_xyz = all_pts[:, :3] - jnp.asarray(pc_range[:3], jnp.float32)
    ref_feats = all_pts[:, 3:]

    assert mean.shape == (V, C_in)
    assert xyz.shape == (N1 + N2, 3)
    assert feats.shape == (N1 + N2, Cp - 3)
    assert cnts.dtype == jnp.int32 and [int(c) for c in cnts] == [N1, N2]
    assert jnp.allclose(mean, ref_mean, atol=1e-5, rtol=1e-5)
    assert jnp.allclose(xyz, ref_xyz, atol=1e-6)
    assert jnp.allclose(feats, ref_feats)

    print("KERNEL_OK")
</pallas_src>

<mosaic_0001>
module attributes {stable_mosaic.version = 11 : i64} {
  func.func @_voxel_mean_kernel(%arg0: i32, %arg1: memref<5x4x128xf32, #tpu.memory_space<vmem>>, %arg2: memref<1x128xi32, #tpu.memory_space<vmem>>, %arg3: memref<4x128xf32, #tpu.memory_space<vmem>>) attributes {dimension_semantics = [#tpu.dimension_semantics<parallel>], iteration_bounds = array<i64: 1>, scalar_prefetch = 0 : i64, scratch_operands = 0 : i64, tpu.core_type = #tpu.core_type<tc>, window_params = [{transform_indices = @transform_0, window_bounds = array<i64: 5, 4, 128>}, {transform_indices = @transform_1, window_bounds = array<i64: 1, 128>}, {transform_indices = @transform_2, window_bounds = array<i64: 4, 128>}]} {
    %c0 = arith.constant 0 : index
    %c0_0 = arith.constant 0 : index
    %c0_1 = arith.constant 0 : index
    %0 = vector.load %arg1[%c0, %c0_0, %c0_1] : memref<5x4x128xf32, #tpu.memory_space<vmem>>, vector<5x4x128xf32>
    %cst = arith.constant dense<0.000000e+00> : vector<4x128xf32>
    %1 = vector.multi_reduction <add>, %0, %cst [0] : vector<5x4x128xf32> to vector<4x128xf32>
    %c0_2 = arith.constant 0 : index
    %c0_3 = arith.constant 0 : index
    %2 = vector.load %arg2[%c0_2, %c0_3] : memref<1x128xi32, #tpu.memory_space<vmem>>, vector<1x128xi32>
    %3 = arith.sitofp %2 : vector<1x128xi32> to vector<1x128xf32>
    %cst_4 = arith.constant 1.000000e+00 : f32
    %4 = vector.broadcast %cst_4 : f32 to vector<1x128xf32>
    %5 = arith.divf %4, %3 : vector<1x128xf32>
    %6 = vector.broadcast %5 : vector<1x128xf32> to vector<4x128xf32>
    %7 = arith.mulf %1, %6 : vector<4x128xf32>
    %c0_5 = arith.constant 0 : index
    %c0_6 = arith.constant 0 : index
    %8 = vector.load %arg3[%c0_5, %c0_6] : memref<4x128xf32, #tpu.memory_space<vmem>>, vector<4x128xf32>
    tpu.vector_store %arg3[%c0_5, %c0_6], %7 {strides = array<i32>} : memref<4x128xf32, #tpu.memory_space<vmem>>, vector<4x128xf32>,
    return
  }
  func.func @transform_0(%arg0: i32) -> (i32, i32, i32) {
    %c0_i32 = arith.constant 0 : i32
    %c0_i32_0 = arith.constant 0 : i32
    %c0_i32_1 = arith.constant 0 : i32
    return %c0_i32, %c0_i32_0, %arg0 : i32, i32, i32
  }
  func.func @transform_1(%arg0: i32) -> (i32, i32) {
    %c0_i32 = arith.constant 0 : i32
    %c0_i32_0 = arith.constant 0 : i32
    return %c0_i32, %arg0 : i32, i32
  }
  func.func @transform_2(%arg0: i32) -> (i32, i32) {
    %c0_i32 = arith.constant 0 : i32
    %c0_i32_0 = arith.constant 0 : i32
    return %c0_i32, %arg0 : i32, i32
  }
}

</mosaic_0001>

<bundles_post_ra>
// kernel: tpu_custom_call.1
= control target key start
LH: loop header
LB: loop body
LE: loop exit
PB: predicated region body
PF: predicated region fallthrough
CT: control target
= control target key end

     0   :  { %7 = vsyncpa [#allocation3], 0  ;;  %s173_s0 = inlined_call_operand.hbm [shape: f32[5,4,128], index: 0, kind: input, shape index: {}]   ;;  %s174_s1 = inlined_call_operand.vmem [shape: s32[1,128], index: 1, kind: input, shape index: {}]   ;;  %s175_s2 = inlined_call_operand.hbm [shape: f32[4,128], index: 2, kind: output, shape index: {}]  }
   0x1   :  { %8 = vsyncpa [#allocation4], 0  ;;  %s122_s9 = smov [#allocation2]   ;;  %s74_s13 = scalar_lea.hbm %s173_s0, 320 }
   0x2   :  { %s14_s10 = sshll.u32 %s122_s9, 4  ;;  %p75_p0 = scmp.ne.s32.totalorder %s173_s0, %s74_s13  ;;  %s15_s10 = int_to_ptr.vmem [resolvable:$true] %s14_s10 }
   0x3   :  { %p78_p1 = scmp.lt.u32.totalorder %s74_s13, %s173_s0 }
   0x5   :  { %p80_p2 = pnand %p78_p1, %p75_p0 }
   0x7   :  { %83 = shalt.err (!%p80_p2)
}
   0x8   :  { %s84_s18 = scalar_lea.vmem %s15_s10, 320  ;;  %p89_p4 = scmp.lt.s32.totalorder %s15_s10, %s15_s10 }
   0x9   :  { %p85_p3 = scmp.ne.s32.totalorder %s15_s10, %s84_s18  ;;  %p90_p5 = scmp.lt.s32.totalorder %s84_s18, %s84_s18 }
   0xb   :  { %p91_p6 = por %p90_p5, %p89_p4 }
   0xd   :  { %p92_p7 = pnand %p91_p6, %p85_p3 }
   0xf   :  { %95 = shalt.err (!%p92_p7)
}
  0x10   :  { %s123_s19 = smov 64   ;;  %s124_s20 = smov 4  }
  0x11   :  { %20 = dma.hbm_to_vmem [thread:$0]  %s173_s0, 320, %s15_s10, [#allocation3], %s123_s19, %s123_s19, %s124_s20  }
  0x12   :  { %118 = dma.done.wait [#allocation3], 320  }
  0x13   :  { %119 = vsyncadd [#allocation3], 4294966976  ;;  %vm31_vm0 = vcmask 1043456   ;;  %v26_v0 = vld [vmem:[#allocation2] sm:$0xf]  ;;  %v46_v10 = vlaneseq  ;;  %s125_s0 = smov [#allocation5]  }
  0x14   :  { %v27_v1 = vld [vmem:[#allocation2 + $0x4] sm:$0xf]  ;;  %v28_v2 = vld [vmem:[#allocation2 + $0x8] sm:$0xf]  ;;  %v32_v3 = vsel %vm31_vm0, %v26_v0, 0.0  ;;  %s59_s25 = sshll.u32 %s125_s0, 4  ;;  %s60_s25 = int_to_ptr.vmem [resolvable:$true] %s59_s25 }
  0x15   :  { %v33_v4 = vsel %vm31_vm0, %v27_v1, 0.0  ;;  %v41_v6 = vld [vmem:[%s174_s1] sm:$0x1]  ;;  %v35_v7 = vsel %vm31_vm0, %v28_v2, 0.0  ;;  %v29_v9 = vld [vmem:[#allocation2 + $0xc] sm:$0xf]  ;;  %p101_p9 = scmp.lt.s32.totalorder %s60_s25, %s60_s25 }
  0x16   :  { %v34_v5 = vadd.f32 %v33_v4, %v32_v3  ;;  %v42_v8 = vcvt.s32.f32 %v41_v6  ;;  %v37_v12 = vsel %vm31_vm0, %v29_v9, 0.0  ;;  %v30_v13 = vld [vmem:[#allocation2 + $0x10] sm:$0xf]  ;;  %v47_v14 = vshrl.u32 %v46_v10, 7  ;;  %s96_s1 = scalar_lea.vmem %s60_s25, 64 }
  0x17   :  { %v39_v16 = vsel %vm31_vm0, %v30_v13, 0.0  ;;  %p97_p8 = scmp.ne.s32.totalorder %s60_s25, %s96_s1  ;;  %p102_p10 = scmp.lt.s32.totalorder %s96_s1, %s96_s1 }
  0x18   :  { %72 = vrcp.f32 %v42_v8  ;;  %v36_v11 = vadd.f32 %v35_v7, %v34_v5  ;;  %v48_v17 = vsub.s32 0, %v47_v14 }
  0x19   :  { %p103_p11 = por %p102_p10, %p101_p9 }
  0x1a   :  { %v38_v15 = vadd.f32 %v37_v12, %v36_v11 }
  0x1b   :  { %p104_p12 = pnand %p103_p11, %p97_p8 }
  0x1c   :  { %v40_v18 = vadd.f32 %v39_v16, %v38_v15 }
  0x22   :  { %v73_v19 = vpop.eup %72 }
  0x23   :  { %v49_v20 = vrot.slane %v73_v19, %v48_v17 }
  0x25   :  { %v51_v21 = vmul.f32 %v49_v20, %v40_v18 }
  0x27   :  { %52 = vst [vmem:[#allocation5] sm:$0xf] %v51_v21 }
  0x28   :  { %107 = shalt.err (!%p104_p12)
}
  0x29   :  { %s108_s28 = scalar_lea.hbm %s175_s2, 64 }
  0x2a   :  { %p109_p13 = scmp.ne.s32.totalorder %s175_s2, %s108_s28  ;;  %p112_p0 = scmp.lt.u32.totalorder %s108_s28, %s175_s2 }
  0x2c   :  { %p114_p1 = pnand %p112_p0, %p109_p13 }
  0x2e   :  { %117 = shalt.err (!%p114_p1)
}
  0x2f   :  { %62 = dma.vmem_to_hbm [thread:$0]  %s60_s25, 64, %s175_s2, [#allocation4]  }
  0x30   :  { %120 = dma.done.wait [#allocation4], 64  }
  0x31   :  { %121 = vsyncadd [#allocation4], 4294967232 }
  0x32   :  { %66 = vsyncpa [#allocation3], 1 }
  0x33   :  { %67 = vsyncpa [#allocation4], 1 }

</bundles_post_ra>
